<compile_context>
chip_gen: v5e
topology: v5e:2x2
jax: 0.10.0
libtpu: 0.0.40
codegen_flags: <defaults>
</compile_context>

<pallas_src>
import functools
import math

import jax
import jax.numpy as jnp
from jax import lax
from jax.experimental import pallas as pl
from jax.experimental.pallas import tpu as pltpu

# Laplacian kernel from the PyTorch module (symmetric, so conv == cross-corr).
_LAPLACIAN = ((-1.0, -1.0, -1.0),
              (-1.0,  8.0, -1.0),
              (-1.0, -1.0, -1.0))


def _gradient_loss_kernel(x_ref, y_ref, out_ref, *,
                          img_h, total_rows, need_tail_mask):
    """One grid step: a (rows, W) slab holding rows // img_h whole images.

    Computes sum((lap(x - y))**2) over the slab and writes it (broadcast) into
    this step's (1, 8, 128) partial-sum output block.
    """
    # Laplacian is linear => lap(x) - lap(y) == lap(x - y): one stencil pass.
    d = x_ref[...].astype(jnp.float32) - y_ref[...].astype(jnp.float32)
    rows, w = d.shape

    col = lax.broadcasted_iota(jnp.int32, (rows, w), 1)
    row = lax.broadcasted_iota(jnp.int32, (rows, w), 0)
    r_in_img = row % img_h  # row index inside each stacked image

    if need_tail_mask:
        # Last grid block is padded past the end of the array: zero the
        # out-of-range rows so they (and any garbage/NaN read from the padded
        # DMA region) contribute nothing.  Valid images always end on an
        # image-bottom row, so their vertical-neighbour masks already ignore
        # the padded rows.
        row_global = pl.program_id(0) * rows + row
        d = jnp.where(row_global < total_rows, d, 0.0)

    # 3-tap box along W (lane axis), zero padding at the image side edges.
    # pltpu.roll follows jnp.roll semantics: roll(v, s)[j] == v[(j - s) % n].
    nbr_e = jnp.where(col != w - 1, pltpu.roll(d, w - 1, 1), 0.0)  # d[:, j + 1]
    nbr_w = jnp.where(col != 0, pltpu.roll(d, 1, 1), 0.0)          # d[:, j - 1]
    rowsum = d + nbr_e + nbr_w

    # 3-tap box along H (sublane axis).  Images are stacked along rows, so the
    # (row % img_h) masks implement zero padding at each image's top/bottom
    # edge AND keep adjacent images in the block from bleeding into each other.
    nbr_s = jnp.where(r_in_img != img_h - 1,
                      pltpu.roll(rowsum, rows - 1, 0), 0.0)        # rowsum[r + 1]
    nbr_n = jnp.where(r_in_img != 0,
                      pltpu.roll(rowsum, 1, 0), 0.0)               # rowsum[r - 1]
    box3x3 = rowsum + nbr_s + nbr_n

    # lap(v) = 8*center - 8 neighbours = 9*v - box3x3(v)
    lap = 9.0 * d - box3x3

    partial = jnp.sum(lap * lap)
    out_ref[...] = jnp.full(out_ref.shape, partial, dtype=out_ref.dtype)


def _images_per_block(n_imgs, img_h, img_w, itemsize, target_tile_bytes):
    """Largest image count per block whose (nb*img_h, img_w) tile fits the
    VMEM budget while keeping the row block a multiple of 8 (sublane
    alignment).  Returns None if no aligned block <= n_imgs exists."""
    img_bytes = max(1, img_h * img_w * itemsize)
    max_imgs = max(1, int(target_tile_bytes) // img_bytes)
    step = 8 // math.gcd(img_h, 8)        # smallest nb with (nb*img_h) % 8 == 0
    cap = min(n_imgs, max_imgs)
    nb = (cap // step) * step
    if nb == 0:
        # Budget too small for an aligned block: take the minimum aligned one
        # if it exists (slight VMEM overshoot beats a whole-array block).
        nb = step if step <= n_imgs else 0
    return nb if nb > 0 else None


def gradient_loss(X, Y, *, target_tile_bytes=1 << 20):
    """Pallas equivalent of GradientLoss.forward(X, Y).  X, Y: (N, 1, H, W)."""
    assert X.shape == Y.shape, (X.shape, Y.shape)
    N, C, H, W = X.shape
    assert C == 1, "GradientLoss uses a single-channel 3x3 Laplacian conv"

    n_imgs = N * C
    total_rows = n_imgs * H
    x2d = X.reshape(total_rows, W)
    y2d = Y.reshape(total_rows, W)

    nb = _images_per_block(n_imgs, H, W, X.dtype.itemsize, target_tile_bytes)
    if nb is None:
        # Block dims == array dims is always a legal BlockSpec.
        # TODO(synk): add halo'd H/W tiling for single images too large for VMEM.
        nb = n_imgs
    rows = nb * H                          # sublane rows per grid step (whole images)
    num_blocks = (n_imgs + nb - 1) // nb
    need_tail_mask = (n_imgs % nb) != 0

    kernel = functools.partial(_gradient_loss_kernel, img_h=H,
                               total_rows=total_rows,
                               need_tail_mask=need_tail_mask)

    partials = pl.pallas_call(
        kernel,
        out_shape=jax.ShapeDtypeStruct((num_blocks, 8, 128), jnp.float32),
        grid_spec=pltpu.PrefetchScalarGridSpec(
            num_scalar_prefetch=0,
            grid=(num_blocks,),
            in_specs=[
                pl.BlockSpec((rows, W), lambda b: (b, 0)),
                pl.BlockSpec((rows, W), lambda b: (b, 0)),
            ],
            out_specs=pl.BlockSpec((1, 8, 128), lambda b: (b, 0, 0)),
        ),
        compiler_params=pltpu.CompilerParams(
            dimension_semantics=("parallel",)),
    )(x2d, y2d)

    total_elems = jnp.float32(N * C * H * W)
    return jnp.sum(partials[:, 0, 0]) / total_elems


def _reference_loss(X, Y):
    """Plain-JAX reference (zero-padded 3x3 Laplacian conv + MSE)."""
    def lap(img):  # img: (H, W)
        H, W = img.shape
        p = jnp.pad(img.astype(jnp.float32), 1)
        acc = jnp.zeros((H, W), jnp.float32)
        for ky in range(3):
            for kx in range(3):
                acc = acc + _LAPLACIAN[ky][kx] * p[ky:ky + H, kx:kx + W]
        return acc

    lap_b = jax.vmap(jax.vmap(lap))  # over N, C
    d = lap_b(X) - lap_b(Y)
    return jnp.mean(d * d)


if __name__ == "__main__":
    key = jax.random.PRNGKey(0)
    k1, k2, k3, k4 = jax.random.split(key, 4)

    # Case 1: everything divides evenly -> single grid step, no tail mask.
    X1 = jax.random.normal(k1, (4, 1, 16, 128), dtype=jnp.float32)
    Y1 = jax.random.normal(k2, (4, 1, 16, 128), dtype=jnp.float32)
    out1 = jax.block_until_ready(gradient_loss(X1, Y1))
    ref1 = jax.block_until_ready(_reference_loss(X1, Y1))
    assert jnp.allclose(out1, ref1, rtol=1e-5, atol=1e-5), (out1, ref1)

    # Case 2: odd batch, H not a multiple of 8, W not a multiple of 128, and a
    # tiny tile budget -> exercises sublane-aligned block selection and the
    # masked padded tail block.
    X2 = jax.random.normal(k3, (3, 1, 12, 160), dtype=jnp.float32)
    Y2 = jax.random.normal(k4, (3, 1, 12, 160), dtype=jnp.float32)
    out2 = jax.block_until_ready(
        gradient_loss(X2, Y2, target_tile_bytes=2 * 12 * 160 * 4))
    ref2 = jax.block_until_ready(_reference_loss(X2, Y2))
    assert jnp.allclose(out2, ref2, rtol=1e-5, atol=1e-5), (out2, ref2)

    print("KERNEL_OK")
</pallas_src>

<mosaic_0001>
module attributes {stable_mosaic.version = 11 : i64} {
  func.func @_gradient_loss_kernel(%arg0: i32, %arg1: memref<64x128xf32, #tpu.memory_space<vmem>>, %arg2: memref<64x128xf32, #tpu.memory_space<vmem>>, %arg3: memref<1x8x128xf32, #tpu.memory_space<vmem>>) attributes {dimension_semantics = [#tpu.dimension_semantics<parallel>], iteration_bounds = array<i64: 1>, scalar_prefetch = 0 : i64, scratch_operands = 0 : i64, tpu.core_type = #tpu.core_type<tc>, window_params = [{transform_indices = @transform_0, window_bounds = array<i64: 64, 128>}, {transform_indices = @transform_1, window_bounds = array<i64: 64, 128>}, {transform_indices = @transform_2, window_bounds = array<i64: 1, 8, 128>}]} {
    %c0 = arith.constant 0 : index
    %c0_0 = arith.constant 0 : index
    %0 = vector.load %arg1[%c0, %c0_0] : memref<64x128xf32, #tpu.memory_space<vmem>>, vector<64x128xf32>
    %c0_1 = arith.constant 0 : index
    %c0_2 = arith.constant 0 : index
    %1 = vector.load %arg2[%c0_1, %c0_2] : memref<64x128xf32, #tpu.memory_space<vmem>>, vector<64x128xf32>
    %2 = arith.subf %0, %1 : vector<64x128xf32>
    %3 = tpu.iota {dimensions = array<i32: 1>} : vector<64x128xi32>
    %4 = tpu.iota {dimensions = array<i32: 0>} : vector<64x128xi32>
    %c16_i32 = arith.constant 16 : i32
    %c0_i32 = arith.constant 0 : i32
    %5 = arith.cmpi eq, %c16_i32, %c0_i32 : i32
    %c1_i32 = arith.constant 1 : i32
    %6 = arith.select %5, %c1_i32, %c16_i32 : i32
    %7 = vector.broadcast %6 : i32 to vector<64x128xi32>
    %8 = arith.remsi %4, %7 : vector<64x128xi32>
    %c0_i32_3 = arith.constant 0 : i32
    %9 = vector.broadcast %c0_i32_3 : i32 to vector<64x128xi32>
    %10 = arith.cmpi ne, %8, %9 : vector<64x128xi32>
    %c0_i32_4 = arith.constant 0 : i32
    %11 = vector.broadcast %c0_i32_4 : i32 to vector<64x128xi32>
    %12 = arith.cmpi slt, %8, %11 : vector<64x128xi32>
    %c0_i32_5 = arith.constant 0 : i32
    %13 = arith.cmpi slt, %6, %c0_i32_5 : i32
    %14 = vector.broadcast %13 : i1 to vector<64x128xi1>
    %15 = vector.broadcast %14 : vector<64x128xi1> to vector<64x128xi1>
    %16 = arith.xori %12, %15 : vector<64x128xi1>
    %17 = arith.andi %16, %10 : vector<64x128xi1>
    %18 = vector.broadcast %6 : i32 to vector<64x128xi32>
    %19 = arith.addi %8, %18 : vector<64x128xi32>
    %20 = arith.select %17, %19, %8 : vector<64x128xi1>, vector<64x128xi32>
    %c127_i32 = arith.constant 127 : i32
    %21 = vector.broadcast %c127_i32 : i32 to vector<64x128xi32>
    %22 = arith.cmpi ne, %3, %21 : vector<64x128xi32>
    %c127_i32_6 = arith.constant 127 : i32
    %23 = tpu.dynamic_rotate %2 by %c127_i32_6 dim 1 : vector<64x128xf32>, i32 -> vector<64x128xf32>
    %cst = arith.constant 0.000000e+00 : f32
    %24 = vector.broadcast %cst : f32 to vector<64x128xf32>
    %25 = arith.select %22, %23, %24 : vector<64x128xi1>, vector<64x128xf32>
    %c0_i32_7 = arith.constant 0 : i32
    %26 = vector.broadcast %c0_i32_7 : i32 to vector<64x128xi32>
    %27 = arith.cmpi ne, %3, %26 : vector<64x128xi32>
    %c1_i32_8 = arith.constant 1 : i32
    %28 = tpu.dynamic_rotate %2 by %c1_i32_8 dim 1 : vector<64x128xf32>, i32 -> vector<64x128xf32>
    %cst_9 = arith.constant 0.000000e+00 : f32
    %29 = vector.broadcast %cst_9 : f32 to vector<64x128xf32>
    %30 = arith.select %27, %28, %29 : vector<64x128xi1>, vector<64x128xf32>
    %31 = arith.addf %2, %25 : vector<64x128xf32>
    %32 = arith.addf %31, %30 : vector<64x128xf32>
    %c15_i32 = arith.constant 15 : i32
    %33 = vector.broadcast %c15_i32 : i32 to vector<64x128xi32>
    %34 = arith.cmpi ne, %20, %33 : vector<64x128xi32>
    %c63_i32 = arith.constant 63 : i32
    %35 = tpu.dynamic_rotate %32 by %c63_i32 dim 0 : vector<64x128xf32>, i32 -> vector<64x128xf32>
    %cst_10 = arith.constant 0.000000e+00 : f32
    %36 = vector.broadcast %cst_10 : f32 to vector<64x128xf32>
    %37 = arith.select %34, %35, %36 : vector<64x128xi1>, vector<64x128xf32>
    %c0_i32_11 = arith.constant 0 : i32
    %38 = vector.broadcast %c0_i32_11 : i32 to vector<64x128xi32>
    %39 = arith.cmpi ne, %20, %38 : vector<64x128xi32>
    %c1_i32_12 = arith.constant 1 : i32
    %40 = tpu.dynamic_rotate %32 by %c1_i32_12 dim 0 : vector<64x128xf32>, i32 -> vector<64x128xf32>
    %cst_13 = arith.constant 0.000000e+00 : f32
    %41 = vector.broadcast %cst_13 : f32 to vector<64x128xf32>
    %42 = arith.select %39, %40, %41 : vector<64x128xi1>, vector<64x128xf32>
    %43 = arith.addf %32, %37 : vector<64x128xf32>
    %44 = arith.addf %43, %42 : vector<64x128xf32>
    %cst_14 = arith.constant 9.000000e+00 : f32
    %45 = vector.broadcast %cst_14 : f32 to vector<64x128xf32>
    %46 = arith.mulf %45, %2 : vector<64x128xf32>
    %47 = arith.subf %46, %44 : vector<64x128xf32>
    %48 = arith.mulf %47, %47 : vector<64x128xf32>
    %49 = vector.shape_cast %48 : vector<64x128xf32> to vector<1x64x128xf32>
    %cst_15 = arith.constant dense<0.000000e+00> : vector<1xf32>
    %50 = vector.multi_reduction <add>, %49, %cst_15 [1, 2] : vector<1x64x128xf32> to vector<1xf32>
    %51 = vector.shape_cast %50 : vector<1xf32> to vector<1x1x1xf32>
    %52 = vector.extract %51[0, 0, 0] : f32 from vector<1x1x1xf32>
    %53 = vector.broadcast %52 : f32 to vector<1x8x128xf32>
    %c0_16 = arith.constant 0 : index
    %c0_17 = arith.constant 0 : index
    %c0_18 = arith.constant 0 : index
    %54 = vector.load %arg3[%c0_16, %c0_17, %c0_18] : memref<1x8x128xf32, #tpu.memory_space<vmem>>, vector<1x8x128xf32>
    tpu.vector_store %arg3[%c0_16, %c0_17, %c0_18], %53 {strides = array<i32>} : memref<1x8x128xf32, #tpu.memory_space<vmem>>, vector<1x8x128xf32>,
    return
  }
  func.func @transform_0(%arg0: i32) -> (i32, i32) {
    %c0_i32 = arith.constant 0 : i32
    %c0_i32_0 = arith.constant 0 : i32
    return %arg0, %c0_i32 : i32, i32
  }
  func.func @transform_1(%arg0: i32) -> (i32, i32) {
    %c0_i32 = arith.constant 0 : i32
    %c0_i32_0 = arith.constant 0 : i32
    return %arg0, %c0_i32 : i32, i32
  }
  func.func @transform_2(%arg0: i32) -> (i32, i32, i32) {
    %c0_i32 = arith.constant 0 : i32
    %c0_i32_0 = arith.constant 0 : i32
    %c0_i32_1 = arith.constant 0 : i32
    return %arg0, %c0_i32, %c0_i32_0 : i32, i32, i32
  }
}

</mosaic_0001>

<bundles_post_ra>
// kernel: tpu_custom_call.1
= control target key start
LH: loop header
LB: loop body
LE: loop exit
PB: predicated region body
PF: predicated region fallthrough
CT: control target
= control target key end

     0   :  { %7 = vsyncpa [#allocation3], 0  ;;  %s724_s0 = inlined_call_operand.hbm [shape: f32[64,128], index: 0, kind: input, shape index: {}]   ;;  %s725_s1 = inlined_call_operand.hbm [shape: f32[64,128], index: 1, kind: input, shape index: {}]   ;;  %s726_s2 = inlined_call_operand.hbm [shape: f32[1,8,128], index: 2, kind: output, shape index: {}]  }
   0x1   :  { %8 = vsyncpa [#allocation6], 0 }
   0x2   :  { %9 = vsyncpa [#allocation4], 0  ;;  %s14_s11 = sshll.u32 %s724_s0, 4  ;;  %s470_s12 = smov [#allocation2]   ;;  %s15_s11 = int_to_ptr.hbm [resolvable:$true] %s14_s11 }
   0x3   :  { %s16_s13 = sshll.u32 %s470_s12, 4  ;;  %s27_s16 = sshll.u32 %s725_s1, 4  ;;  %s17_s13 = int_to_ptr.vmem [resolvable:$true] %s16_s13  ;;  %s28_s16 = int_to_ptr.hbm [resolvable:$true] %s27_s16 }
   0x4   :  { %s471_s17 = smov 128   ;;  %s472_s18 = smov 8  }
   0x5   :  { %22 = dma.hbm_to_vmem [thread:$0]  %s15_s11, 1024, %s17_s13, [#allocation3], %s471_s17, %s471_s17, %s472_s18  }
   0x6   :  { %s473_s19 = smov [#allocation5]  }
   0x7   :  { %s29_s20 = sshll.u32 %s473_s19, 4  ;;  %s30_s20 = int_to_ptr.vmem [resolvable:$true] %s29_s20 }
   0x8   :  { %35 = dma.hbm_to_vmem [thread:$0]  %s28_s16, 1024, %s30_s20, [#allocation6], %s471_s17, %s471_s17, %s472_s18  }
   0x9   :  { %464 = dma.done.wait [#allocation3], 1024  }
   0xa   :  { %465 = vsyncadd [#allocation3], 4294966272 }
   0xb   :  { %466 = dma.done.wait [#allocation6], 1024  }
   0xc   :  { %467 = vsyncadd [#allocation6], 4294966272  ;;  %v45_v0 = vld [vmem:[#allocation2 + $0x8] sm:$0xff]  ;;  %v44_v2 = vld [vmem:[#allocation2] sm:$0xff]  ;;  %s474_s0 = smov 127   ;;  %s475_s1 = smov 1   ;;  %v68_v27 = vlaneseq }
   0xd   :  { %v53_v1 = vld [vmem:[#allocation5 + $0x8] sm:$0xff]  ;;  %v52_v4 = vld [vmem:[#allocation5] sm:$0xff]  ;;  %v46_v6 = vld [vmem:[#allocation2 + $0x10] sm:$0xff]  ;;  %s372_s23 = sshll.u32 %s726_s2, 4  ;;  %s476_s24 = smov [#allocation7]   ;;  %s373_s23 = int_to_ptr.hbm [resolvable:$true] %s372_s23 }
   0xe   :  { %v498_v3 = vsub.f32 %v45_v0, %v53_v1  ;;  %v500_v5 = vsub.f32 %v44_v2, %v52_v4  ;;  %v54_v7 = vld [vmem:[#allocation5 + $0x10] sm:$0xff]  ;;  %v51_v8 = vld [vmem:[#allocation2 + $0x38] sm:$0xff]  ;;  %v48_v14 = vld [vmem:[#allocation2 + $0x20] sm:$0xff]  ;;  %v546_v29 = vand.u32 127, %v68_v27  ;;  %v553_v35 = vshrl.u32 %v68_v27, 7  ;;  %s370_s25 = sshll.u32 %s476_s24, 4  ;;  %s371_s25 = int_to_ptr.vmem [resolvable:$true] %s370_s25 }
   0xf   :  { %v59_v9 = vld [vmem:[#allocation5 + $0x38] sm:$0xff]  ;;  %v508_v10 = vsub.f32 %v46_v6, %v54_v7  ;;  %v56_v15 = vld [vmem:[#allocation5 + $0x20] sm:$0xff]  ;;  %v49_v18 = vld [vmem:[#allocation2 + $0x28] sm:$0xff] }
  0x10   :  { %178 = vrot.lane.b32.xlu0 %v498_v3, %s474_s0  ;;  %203 = vrot.lane.b32.xlu2 %v498_v3, %s475_s1  ;;  %v510_v11 = vsub.f32 %v51_v8, %v59_v9  ;;  %v47_v12 = vld [vmem:[#allocation2 + $0x18] sm:$0xff]  ;;  %v520_v17 = vsub.f32 %v48_v14, %v56_v15  ;;  %v57_v19 = vld [vmem:[#allocation5 + $0x28] sm:$0xff]  ;;  %v50_v20 = vld [vmem:[#allocation2 + $0x30] sm:$0xff]  ;;  %vm175_vm0 = vcmp.ne.s32.totalorder %v546_v29, 127  ;;  %vm200_vm1 = vcmp.ne.s32.totalorder %v546_v29, 0 }
  0x11   :  { %176 = vrot.lane.b32.xlu1 %v500_v5, %s474_s0  ;;  %v55_v13 = vld [vmem:[#allocation5 + $0x18] sm:$0xff]  ;;  %v58_v21 = vld [vmem:[#allocation5 + $0x30] sm:$0xff]  ;;  %v534_v22 = vsub.f32 %v49_v18, %v57_v19  ;;  %v72_v43 = vadd.s32 8, %v553_v35  ;;  %v73_v51 = vadd.s32 16, %v553_v35  ;;  %v323_v57 = vmul.f32 9.0, %v500_v5 }
  0x12   :  { %v518_v16 = vsub.f32 %v47_v12, %v55_v13  ;;  %v536_v23 = vsub.f32 %v50_v20, %v58_v21  ;;  %vm257_vm2 = vcmp.lt.s32.totalorder %v553_v35, 7  ;;  %v74_v59 = vadd.s32 24, %v553_v35 }
  0x13   :  { %v90_v53 = vand.u32 15, %v72_v43  ;;  %v587_v60 = vmul.f32 9.0, %v508_v10  ;;  %v83_v63 = vand.u32 15, %v553_v35  ;;  %v97_v0 = vand.u32 15, %v73_v51 }
  0x14   :  { %vm290_vm3 = vcmp.lt.s32.totalorder %v553_v35, 1  ;;  %v104_v13 = vand.u32 15, %v74_v59 }
  0x15   :  { %vm595_vm4 = vcmp.ne.s32.totalorder %v90_v53, 15  ;;  %vm614_vm5 = vcmp.ne.s32.totalorder %v83_v63, 0  ;;  %vm622_vm6 = vcmp.ne.s32.totalorder %v97_v0, 0 }
  0x16   :  { %vm642_vm7 = vcmp.ne.s32.totalorder %v104_v13, 15 }
  0x18   :  { %180 = vrot.lane.b32.xlu0 %v508_v10, %s474_s0  ;;  %205 = vrot.lane.b32.xlu2 %v508_v10, %s475_s1 }
  0x19   :  { %190 = vrot.lane.b32.xlu1 %v510_v11, %s474_s0 }
  0x20   :  { %182 = vrot.lane.b32.xlu0 %v518_v16, %s474_s0  ;;  %184 = vrot.lane.b32.xlu2 %v520_v17, %s474_s0 }
  0x21   :  { %201 = vrot.lane.b32.xlu1 %v500_v5, %s475_s1 }
  0x28   :  { %215 = vrot.lane.b32.xlu0 %v510_v11, %s475_s1  ;;  %209 = vrot.lane.b32.xlu2 %v520_v17, %s475_s1 }
  0x29   :  { %207 = vrot.lane.b32.xlu1 %v518_v16, %s475_s1 }
  0x30   :  { %186 = vrot.lane.b32.xlu0 %v534_v22, %s474_s0  ;;  %211 = vrot.lane.b32.xlu2 %v534_v22, %s475_s1 }
  0x31   :  { %188 = vrot.lane.b32.xlu1 %v536_v23, %s474_s0 }
  0x38   :  { %213 = vrot.lane.b32.xlu0 %v536_v23, %s475_s1 }
  0x6a   :  { %v204_v24 = vpop.permute.xlu2 %203 }
  0x6b   :  { %v218_v40 = vsel %vm200_vm1, %v204_v24, 0.0 }
  0x72   :  { %v206_v25 = vpop.permute.xlu2 %205 }
  0x73   :  { %v219_v38 = vsel %vm200_vm1, %v206_v25, 0.0 }
  0x7a   :  { %v185_v31 = vpop.permute.xlu2 %184 }
  0x7b   :  { %v196_v45 = vsel %vm175_vm0, %v185_v31, 0.0 }
  0x7c   :  { %v229_v52 = vadd.f32 %v196_v45, %v520_v17 }
  0x82   :  { %v179_v26 = vpop.permute.xlu0 %178  ;;  %v210_v48 = vpop.permute.xlu2 %209 }
  0x83   :  { %v177_v28 = vpop.permute.xlu1 %176  ;;  %v193_v34 = vsel %vm175_vm0, %v179_v26, 0.0  ;;  %v221_v56 = vsel %vm200_vm1, %v210_v48, 0.0 }
  0x84   :  { %v192_v37 = vsel %vm175_vm0, %v177_v28, 0.0  ;;  %v226_v39 = vadd.f32 %v193_v34, %v498_v3  ;;  %v593_v2 = vadd.f32 %v229_v52, %v221_v56  ;;  %v78_v28 = vadd.s32 56, %v553_v35 }
  0x85   :  { %v225_v42 = vadd.f32 %v192_v37, %v500_v5  ;;  %v77_v56 = vadd.s32 48, %v553_v35 }
  0x86   :  { %v234_v49 = vadd.f32 %v226_v39, %v218_v40  ;;  %v253_v25 = vrot.slane %v593_v2, 1  ;;  %v132_v48 = vand.u32 15, %v78_v28  ;;  %v286_v63 = vrot.slane %v593_v2, 7 }
  0x87   :  { %v125_v19 = vand.u32 15, %v77_v56  ;;  %v327_v28 = vmul.f32 9.0, %v520_v17 }
  0x88   :  { %v250_v61 = vrot.slane %v234_v49, 1  ;;  %v283_v21 = vrot.slane %v234_v49, 7  ;;  %vm663_vm8 = vcmp.ne.s32.totalorder %v132_v48, 15 }
  0x89   :  { %vm695_vm11 = vcmp.ne.s32.totalorder %v125_v19, 0 }
  0x8a   :  { %v181_v30 = vpop.permute.xlu0 %180  ;;  %v212_v40 = vpop.permute.xlu2 %211 }
  0x8b   :  { %v191_v32 = vpop.permute.xlu1 %190  ;;  %v194_v33 = vsel %vm175_vm0, %v181_v30, 0.0  ;;  %v75_v30 = vadd.s32 32, %v553_v35 }
  0x8c   :  { %v227_v36 = vadd.f32 %v194_v33, %v508_v10  ;;  %v199_v55 = vsel %vm175_vm0, %v191_v32, 0.0  ;;  %v324_v32 = vmul.f32 9.0, %v498_v3 }
  0x8d   :  { %v232_v1 = vadd.f32 %v199_v55, %v510_v11  ;;  %v222_v55 = vsel %vm200_vm1, %v212_v40, 0.0 }
  0x8e   :  { %v566_v44 = vadd.f32 %v227_v36, %v219_v38 }
  0x90   :  { %v251_v54 = vrot.slane %v566_v44, 1  ;;  %v284_v15 = vrot.slane %v566_v44, 7 }
  0x92   :  { %v183_v41 = vpop.permute.xlu0 %182  ;;  %v263_v6 = vsel %vm257_vm2, %v250_v61, %v251_v54  ;;  %v296_v37 = vsel %vm290_vm3, %v283_v21, %v284_v15 }
  0x93   :  { %v202_v46 = vpop.permute.xlu1 %201  ;;  %v195_v58 = vsel %vm175_vm0, %v183_v41, 0.0  ;;  %v267_v24 = vsel %vm595_vm4, %v263_v6, 0.0  ;;  %v301_v53 = vsel %vm622_vm6, %v296_v37, 0.0 }
  0x94   :  { %v217_v47 = vsel %vm200_vm1, %v202_v46, 0.0  ;;  %v228_v7 = vadd.f32 %v195_v58, %v518_v16  ;;  %v308_v38 = vadd.f32 %v267_v24, %v234_v49  ;;  %v76_v46 = vadd.s32 40, %v553_v35 }
  0x95   :  { %v572_v50 = vadd.f32 %v225_v42, %v217_v47  ;;  %v111_v49 = vand.u32 15, %v75_v30 }
  0x97   :  { %v249_v62 = vrot.slane %v572_v50, 1  ;;  %v282_v10 = vrot.slane %v572_v50, 7  ;;  %vm668_vm9 = vcmp.ne.s32.totalorder %v111_v49, 0 }
  0x99   :  { %v264_v18 = vsel %vm257_vm2, %v249_v62, %v250_v61  ;;  %v297_v33 = vsel %vm290_vm3, %v282_v10, %v283_v21 }
  0x9a   :  { %v216_v4 = vpop.permute.xlu0 %215  ;;  %v307_v34 = vadd.f32 %v264_v18, %v572_v50  ;;  %v316_v47 = vadd.f32 %v308_v38, %v297_v33 }
  0x9b   :  { %v224_v8 = vsel %vm200_vm1, %v216_v4, 0.0  ;;  %v208_v9 = vpop.permute.xlu1 %207  ;;  %v118_v4 = vand.u32 15, %v76_v46 }
  0x9c   :  { %v605_v12 = vadd.f32 %v232_v1, %v224_v8  ;;  %v220_v14 = vsel %vm200_vm1, %v208_v9, 0.0  ;;  %v332_v5 = vsub.f32 %v324_v32, %v316_v47 }
  0x9d   :  { %v236_v20 = vadd.f32 %v228_v7, %v220_v14  ;;  %v326_v14 = vmul.f32 9.0, %v518_v16  ;;  %vm676_vm10 = vcmp.ne.s32.totalorder %v118_v4, 15 }
  0x9e   :  { %v289_v26 = vrot.slane %v605_v12, 7 }
  0x9f   :  { %v252_v31 = vrot.slane %v236_v20, 1  ;;  %v285_v0 = vrot.slane %v236_v20, 7 }
  0xa0   :  { %v298_v36 = vsel %vm290_vm3, %v289_v26, %v282_v10 }
  0xa1   :  { %v299_v39 = vsel %vm614_vm5, %v298_v36, 0.0  ;;  %v262_v3 = vsel %vm257_vm2, %v251_v54, %v252_v31  ;;  %v261_v43 = vsel %vm257_vm2, %v252_v31, %v253_v25  ;;  %v294_v21 = vsel %vm290_vm3, %v285_v0, %v286_v63 }
  0xa2   :  { %v315_v41 = vadd.f32 %v307_v34, %v299_v39  ;;  %v187_v45 = vpop.permute.xlu0 %186  ;;  %v309_v51 = vadd.f32 %v262_v3, %v566_v44  ;;  %v269_v59 = vsel %vm642_vm7, %v261_v43, 0.0  ;;  %v295_v31 = vsel %vm290_vm3, %v284_v15, %v285_v0 }
  0xa3   :  { %v189_v52 = vpop.permute.xlu1 %188  ;;  %v197_v54 = vsel %vm175_vm0, %v187_v45, 0.0  ;;  %v310_v9 = vadd.f32 %v269_v59, %v236_v20  ;;  %v340_v20 = vmul.f32 %v332_v5, %v332_v5  ;;  %v328_v3 = vmul.f32 9.0, %v534_v22 }
  0xa4   :  { %v331_v58 = vsub.f32 %v323_v57, %v315_v41  ;;  %v230_v61 = vadd.f32 %v197_v54, %v534_v22  ;;  %v198_v44 = vsel %vm175_vm0, %v189_v52, 0.0  ;;  %v317_v1 = vadd.f32 %v309_v51, %v301_v53 }
  0xa5   :  { %v256_v57 = vrot.slane %v605_v12, 1  ;;  %v231_v10 = vadd.f32 %v198_v44, %v536_v23  ;;  %v318_v34 = vadd.f32 %v310_v9, %v295_v31  ;;  %v330_v54 = vmul.f32 9.0, %v510_v11 }
  0xa6   :  { %v238_v7 = vadd.f32 %v230_v61, %v222_v55  ;;  %v339_v13 = vmul.f32 %v331_v58, %v331_v58  ;;  %v333_v30 = vsub.f32 %v587_v60, %v317_v1  ;;  %v303_v60 = vsel %vm668_vm9, %v294_v21, 0.0 }
  0xa7   :  { %v265_v33 = vsel %vm257_vm2, %v256_v57, %v249_v62  ;;  %v334_v40 = vsub.f32 %v326_v14, %v318_v34 }
  0xa8   :  { %v254_v18 = vrot.slane %v238_v7, 1  ;;  %v287_v37 = vrot.slane %v238_v7, 7  ;;  %v341_v50 = vmul.f32 %v333_v30, %v333_v30  ;;  %v273_v62 = vsel %vm663_vm8, %v265_v33, 0.0 }
  0xa9   :  { %v314_v47 = vadd.f32 %v273_v62, %v605_v12  ;;  %v342_v55 = vmul.f32 %v334_v40, %v334_v40 }
  0xaa   :  { %v214_v27 = vpop.permute.xlu0 %213  ;;  %v260_v16 = vsel %vm257_vm2, %v253_v25, %v254_v18  ;;  %v347_v25 = vadd.f32 %v340_v20, %v339_v13  ;;  %v293_v52 = vsel %vm290_vm3, %v286_v63, %v287_v37 }
  0xab   :  { %v223_v32 = vsel %vm200_vm1, %v214_v27, 0.0  ;;  %v311_v17 = vadd.f32 %v260_v16, %v593_v2  ;;  %v329_v2 = vmul.f32 9.0, %v536_v23 }
  0xac   :  { %v239_v36 = vadd.f32 %v231_v10, %v223_v32  ;;  %v348_v51 = vadd.f32 %v347_v25, %v341_v50 }
  0xad   :  { %v319_v39 = vadd.f32 %v311_v17, %v303_v60 }
  0xae   :  { %v255_v29 = vrot.slane %v239_v36, 1  ;;  %v288_v38 = vrot.slane %v239_v36, 7  ;;  %v349_v44 = vadd.f32 %v348_v51, %v342_v55 }
  0xaf   :  { %v335_v49 = vsub.f32 %v327_v28, %v319_v39 }
  0xb0   :  { %v258_v41 = vsel %vm257_vm2, %v255_v29, %v256_v57  ;;  %v259_v42 = vsel %vm257_vm2, %v254_v18, %v255_v29  ;;  %v292_v43 = vsel %vm290_vm3, %v287_v37, %v288_v38  ;;  %v291_v22 = vsel %vm290_vm3, %v288_v38, %v289_v26 }
  0xb1   :  { %v271_v45 = vsel %vm676_vm10, %v259_v42, 0.0  ;;  %v313_v46 = vadd.f32 %v258_v41, %v239_v36  ;;  %v305_v23 = vsel %vm695_vm11, %v292_v43, 0.0  ;;  %v322_v58 = vadd.f32 %v314_v47, %v291_v22 }
  0xb2   :  { %v312_v48 = vadd.f32 %v271_v45, %v238_v7  ;;  %v343_v59 = vmul.f32 %v335_v49, %v335_v49 }
  0xb3   :  { %v321_v53 = vadd.f32 %v313_v46, %v305_v23  ;;  %v338_v0 = vsub.f32 %v330_v54, %v322_v58 }
  0xb4   :  { %v320_v56 = vadd.f32 %v312_v48, %v293_v52  ;;  %v350_v4 = vadd.f32 %v349_v44, %v343_v59 }
  0xb5   :  { %v337_v26 = vsub.f32 %v329_v2, %v321_v53  ;;  %v346_v6 = vmul.f32 %v338_v0, %v338_v0 }
  0xb6   :  { %v336_v61 = vsub.f32 %v328_v3, %v320_v56 }
  0xb7   :  { %v345_v12 = vmul.f32 %v337_v26, %v337_v26 }
  0xb8   :  { %v344_v1 = vmul.f32 %v336_v61, %v336_v61 }
  0xba   :  { %v351_v5 = vadd.f32 %v350_v4, %v344_v1 }
  0xbc   :  { %v352_v7 = vadd.f32 %v351_v5, %v345_v12 }
  0xbe   :  { %v353_v57 = vadd.f32 %v352_v7, %v346_v6 }
  0xc0   :  { %354 = vadd.xlane.f32.xlu1 %v353_v57 }
 0x133   :  { %v355_v35 = vpop.xlane.xlu1 %354 }
 0x134   :  { %v356_v63 = vrot.slane %v355_v35, 4 }
 0x136   :  { %v357_v8 = vadd.f32 %v356_v63, %v355_v35 }
 0x138   :  { %v358_v11 = vrot.slane %v357_v8, 2 }
 0x13a   :  { %v359_v9 = vadd.f32 %v358_v11, %v357_v8 }
 0x13c   :  { %v360_v10 = vrot.slane %v359_v9, 1 }
 0x13e   :  { %v361_v13 = vadd.f32 %v360_v10, %v359_v9 }
 0x140   :  { %383 = vpush %v361_v13 }
 0x171   :  { %s384_s26 = spop %383 }
 0x172   :  { %v363_v14 = vstv %s384_s26 }
 0x173   :  { %364 = vst [vmem:[#allocation7] sm:$0xff] %v363_v14 }
 0x174   :  { %375 = dma.vmem_to_hbm [thread:$0]  %s371_s25, 128, %s373_s23, [#allocation4]  }
 0x175   :  { %468 = dma.done.wait [#allocation4], 128  }
 0x176   :  { %469 = vsyncadd [#allocation4], 4294967168 }
 0x177   :  { %380 = vsyncpa [#allocation3], 1 }
 0x178   :  { %381 = vsyncpa [#allocation6], 1 }
 0x179   :  { %382 = vsyncpa [#allocation4], 1 }

</bundles_post_ra>
